<compile_context>
chip_gen: v7x
topology: tpu7x:2x2x1
jax: 0.10.0
libtpu: 0.0.40
codegen_flags: <defaults>
</compile_context>

<pallas_src>
import jax
import jax.numpy as jnp
from jax.experimental import pallas as pl
from jax.experimental.pallas import tpu as pltpu


def _round_up(x, m):
    return (x + m - 1) // m * m


def _transition_kernel(x_ref, scale_ref, shift_ref, w_ref, o_ref):
    # x_ref    : (4, T, Cin_p) f32   -- 4 taps of each 2x2 pool window (gathered in wrapper)
    # scale_ref: (1, Cin_p)    f32   -- folded inference-BN scale = gamma/sqrt(var+eps)
    # shift_ref: (1, Cin_p)    f32   -- folded inference-BN shift = beta - mean*scale
    # w_ref    : (Cin_p, Cout_p) bf16 -- 1x1 conv weight^T * 0.25 (pool divisor folded in)
    # o_ref    : (T, Cout_p)   f32
    _, t, c = x_ref.shape

    # Hoist the per-channel broadcasts: one sublane-broadcast each per tile,
    # instead of one per tap-multiply (broadcast_in_dim is not CSE'd).
    scale = jnp.broadcast_to(scale_ref[...], (t, c))
    shift = jnp.broadcast_to(shift_ref[...], (t, c))

    # BN(eval) + ReLU per tap, then 2x2 average pool as plain VPU adds.
    acc = jnp.maximum(x_ref[0] * scale + shift, 0.0)
    for k in range(1, 4):
        acc = acc + jnp.maximum(x_ref[k] * scale + shift, 0.0)

    # 1x1 conv on the MXU: bf16 operands, f32 accumulation.
    o_ref[...] = jnp.dot(acc.astype(jnp.bfloat16), w_ref[...],
                         preferred_element_type=jnp.float32).astype(o_ref.dtype)


def transition_forward(x_nchw, gamma, beta, running_mean, running_var, conv_w,
                       eps=1e-5, tile_out_rows=256):
    """DenseNet Transition forward (inference-mode BN).

    x_nchw: (N, Cin, H, W) float32, conv_w: (Cout, Cin, 1, 1).
    Returns (N, Cout, H//2, W//2) float32.
    """
    N, cin, H, W = x_nchw.shape
    cout = conv_w.shape[0]
    Ho, Wo = H // 2, W // 2            # PyTorch avg_pool2d(2): trailing odd row/col dropped
    HWo = Ho * Wo
    rows = N * HWo                     # batch and output pixels flattened together

    cin_p = _round_up(cin, 128)
    cout_p = _round_up(cout, 128)

    x = x_nchw.astype(jnp.float32)
    if H % 2 or W % 2:
        x = x[:, :, : 2 * Ho, : 2 * Wo]

    # Gather the 4 taps of every 2x2 window up front with a single transpose:
    #   x4[2*i+j, n*HWo + ho*Wo + wo, c] = x[n, c, 2*ho+i, 2*wo+j]
    x4 = x.reshape(N, cin, Ho, 2, Wo, 2)
    x4 = jnp.transpose(x4, (3, 5, 0, 2, 4, 1)).reshape(4, rows, cin)

    # Row tiling: full-size tiles, rows padded up to the tile so the grid is a
    # single parallel axis with no ragged last step.
    if rows <= tile_out_rows:
        tile = _round_up(rows, 8)
    else:
        tile = (tile_out_rows // 8) * 8
    rows_p = _round_up(rows, tile)
    n_tiles = rows_p // tile

    if rows_p != rows or cin_p != cin:
        x4 = jnp.pad(x4, ((0, 0), (0, rows_p - rows), (0, cin_p - cin)))

    # Fold BN (inference, running stats) into a per-channel affine; padded
    # channels stay zero so they contribute nothing through ReLU * zero weights.
    inv_std = 1.0 / jnp.sqrt(running_var.astype(jnp.float32) + eps)
    scale = gamma.astype(jnp.float32) * inv_std
    shift = beta.astype(jnp.float32) - running_mean.astype(jnp.float32) * scale
    scale = jnp.pad(scale, (0, cin_p - cin)).reshape(1, cin_p)
    shift = jnp.pad(shift, (0, cin_p - cin)).reshape(1, cin_p)

    # 1x1 conv weight as a lane-dense (Cin_p, Cout_p) bf16 matmul operand, with
    # the avg-pool's 1/4 folded in (exact in bf16).
    w2d = conv_w.reshape(cout, cin).T.astype(jnp.float32) * 0.25
    w2d = jnp.pad(w2d, ((0, cin_p - cin), (0, cout_p - cout))).astype(jnp.bfloat16)

    # Explicit VMEM budget (double-buffered activation blocks + resident
    # constants + in-kernel temporaries), capped at v7x's 64 MiB physical VMEM.
    x_blk = 4 * tile * cin_p * 4
    o_blk = tile * cout_p * 4
    const_b = cin_p * cout_p * 2 + 2 * cin_p * 4
    vmem_limit = int(min(max(2 * (2 * x_blk + 2 * o_blk) + 2 * const_b, 16 << 20),
                         64 << 20))

    cost = pl.CostEstimate(
        flops=2 * rows * cin_p * cout_p + 12 * rows * cin_p,
        transcendentals=0,
        bytes_accessed=(4 * rows_p * cin_p * 4 + rows_p * cout_p * 4
                        + cin_p * cout_p * 2 + 2 * cin_p * 4),
    )

    out = pl.pallas_call(
        _transition_kernel,
        out_shape=jax.ShapeDtypeStruct((rows_p, cout_p), jnp.float32),
        grid_spec=pltpu.PrefetchScalarGridSpec(
            num_scalar_prefetch=0,
            grid=(n_tiles,),
            in_specs=[
                pl.BlockSpec((4, tile, cin_p), lambda s: (0, s, 0)),
                pl.BlockSpec((1, cin_p), lambda s: (0, 0)),          # resident
                pl.BlockSpec((1, cin_p), lambda s: (0, 0)),          # resident
                pl.BlockSpec((cin_p, cout_p), lambda s: (0, 0)),     # resident
            ],
            out_specs=pl.BlockSpec((tile, cout_p), lambda s: (s, 0)),
        ),
        compiler_params=pltpu.CompilerParams(
            dimension_semantics=("parallel",),
            vmem_limit_bytes=vmem_limit,
        ),
        cost_estimate=cost,
    )(x4, scale, shift, w2d)

    # glue back to NCHW, dropping the row/channel padding
    out = out[:rows, :cout].reshape(N, Ho, Wo, cout)
    return jnp.transpose(out, (0, 3, 1, 2))


def _reference(x, gamma, beta, mean, var, conv_w, eps=1e-5):
    """Pure-JAX reference matching the PyTorch forward (inference-mode BN)."""
    xn = (x - mean[None, :, None, None]) / jnp.sqrt(var + eps)[None, :, None, None]
    y = jnp.maximum(xn * gamma[None, :, None, None] + beta[None, :, None, None], 0.0)
    Cout, Cin = conv_w.shape[0], conv_w.shape[1]
    z = jnp.einsum("nchw,oc->nohw", y, conv_w.reshape(Cout, Cin))
    N, Co, H, W = z.shape
    return z.reshape(N, Co, H // 2, 2, W // 2, 2).mean(axis=(3, 5))


if __name__ == "__main__":
    key = jax.random.PRNGKey(0)
    k_x, k_g, k_b, k_m, k_v, k_w = jax.random.split(key, 6)

    N, in_planes, out_planes, H, W = 2, 4, 8, 16, 16

    x = jax.random.normal(k_x, (N, in_planes, H, W), dtype=jnp.float32)
    gamma = jax.random.uniform(k_g, (in_planes,), jnp.float32, 0.5, 1.5)
    beta = 0.1 * jax.random.normal(k_b, (in_planes,), dtype=jnp.float32)
    running_mean = 0.1 * jax.random.normal(k_m, (in_planes,), dtype=jnp.float32)
    running_var = jax.random.uniform(k_v, (in_planes,), jnp.float32, 0.5, 1.5)
    conv_w = 0.2 * jax.random.normal(k_w, (out_planes, in_planes, 1, 1), dtype=jnp.float32)

    out = transition_forward(x, gamma, beta, running_mean, running_var, conv_w)
    out = jax.block_until_ready(out)

    ref = _reference(x, gamma, beta, running_mean, running_var, conv_w)
    assert out.shape == (N, out_planes, H // 2, W // 2), out.shape
    # bf16 MXU operands (by design) => relaxed tolerance vs the pure-f32 reference.
    err = float(jnp.max(jnp.abs(out - ref)))
    assert jnp.allclose(out, ref, atol=3e-2, rtol=3e-2), err

    print("KERNEL_OK")
</pallas_src>

<mosaic_0001>
module attributes {stable_mosaic.version = 11 : i64} {
  func.func @_transition_kernel(%arg0: i32, %arg1: memref<4x128x128xf32, #tpu.memory_space<vmem>>, %arg2: memref<1x128xf32, #tpu.memory_space<vmem>>, %arg3: memref<1x128xf32, #tpu.memory_space<vmem>>, %arg4: memref<128x128xbf16, #tpu.memory_space<vmem>>, %arg5: memref<128x128xf32, #tpu.memory_space<vmem>>) attributes {dimension_semantics = [#tpu.dimension_semantics<parallel>], iteration_bounds = array<i64: 1>, scalar_prefetch = 0 : i64, scratch_operands = 0 : i64, tpu.core_type = #tpu.core_type<tc>, window_params = [{transform_indices = @transform_0, window_bounds = array<i64: 4, 128, 128>}, {pipeline_mode = #tpu.pipeline_mode<synchronous>, transform_indices = @transform_1, window_bounds = array<i64: 1, 128>}, {pipeline_mode = #tpu.pipeline_mode<synchronous>, transform_indices = @transform_2, window_bounds = array<i64: 1, 128>}, {pipeline_mode = #tpu.pipeline_mode<synchronous>, transform_indices = @transform_3, window_bounds = array<i64: 128, 128>}, {transform_indices = @transform_4, window_bounds = array<i64: 128, 128>}]} {
    %c0 = arith.constant 0 : index
    %c0_0 = arith.constant 0 : index
    %0 = vector.load %arg2[%c0, %c0_0] : memref<1x128xf32, #tpu.memory_space<vmem>>, vector<1x128xf32>
    %1 = vector.shape_cast %0 : vector<1x128xf32> to vector<1x128xf32>
    %2 = vector.broadcast %1 : vector<1x128xf32> to vector<128x128xf32>
    %c0_1 = arith.constant 0 : index
    %c0_2 = arith.constant 0 : index
    %3 = vector.load %arg3[%c0_1, %c0_2] : memref<1x128xf32, #tpu.memory_space<vmem>>, vector<1x128xf32>
    %4 = vector.shape_cast %3 : vector<1x128xf32> to vector<1x128xf32>
    %5 = vector.broadcast %4 : vector<1x128xf32> to vector<128x128xf32>
    %c0_3 = arith.constant 0 : index
    %c0_4 = arith.constant 0 : index
    %c0_5 = arith.constant 0 : index
    %6 = vector.load %arg1[%c0_3, %c0_4, %c0_5] : memref<4x128x128xf32, #tpu.memory_space<vmem>>, vector<1x128x128xf32>
    %7 = vector.shape_cast %6 : vector<1x128x128xf32> to vector<128x128xf32>
    %8 = arith.mulf %7, %2 : vector<128x128xf32>
    %9 = arith.addf %8, %5 : vector<128x128xf32>
    %cst = arith.constant 0.000000e+00 : f32
    %10 = vector.broadcast %cst : f32 to vector<128x128xf32>
    %11 = arith.maximumf %9, %10 : vector<128x128xf32>
    %c1 = arith.constant 1 : index
    %c0_6 = arith.constant 0 : index
    %c0_7 = arith.constant 0 : index
    %12 = vector.load %arg1[%c1, %c0_6, %c0_7] : memref<4x128x128xf32, #tpu.memory_space<vmem>>, vector<1x128x128xf32>
    %13 = vector.shape_cast %12 : vector<1x128x128xf32> to vector<128x128xf32>
    %14 = arith.mulf %13, %2 : vector<128x128xf32>
    %15 = arith.addf %14, %5 : vector<128x128xf32>
    %cst_8 = arith.constant 0.000000e+00 : f32
    %16 = vector.broadcast %cst_8 : f32 to vector<128x128xf32>
    %17 = arith.maximumf %15, %16 : vector<128x128xf32>
    %18 = arith.addf %11, %17 : vector<128x128xf32>
    %c2 = arith.constant 2 : index
    %c0_9 = arith.constant 0 : index
    %c0_10 = arith.constant 0 : index
    %19 = vector.load %arg1[%c2, %c0_9, %c0_10] : memref<4x128x128xf32, #tpu.memory_space<vmem>>, vector<1x128x128xf32>
    %20 = vector.shape_cast %19 : vector<1x128x128xf32> to vector<128x128xf32>
    %21 = arith.mulf %20, %2 : vector<128x128xf32>
    %22 = arith.addf %21, %5 : vector<128x128xf32>
    %cst_11 = arith.constant 0.000000e+00 : f32
    %23 = vector.broadcast %cst_11 : f32 to vector<128x128xf32>
    %24 = arith.maximumf %22, %23 : vector<128x128xf32>
    %25 = arith.addf %18, %24 : vector<128x128xf32>
    %c3 = arith.constant 3 : index
    %c0_12 = arith.constant 0 : index
    %c0_13 = arith.constant 0 : index
    %26 = vector.load %arg1[%c3, %c0_12, %c0_13] : memref<4x128x128xf32, #tpu.memory_space<vmem>>, vector<1x128x128xf32>
    %27 = vector.shape_cast %26 : vector<1x128x128xf32> to vector<128x128xf32>
    %28 = arith.mulf %27, %2 : vector<128x128xf32>
    %29 = arith.addf %28, %5 : vector<128x128xf32>
    %cst_14 = arith.constant 0.000000e+00 : f32
    %30 = vector.broadcast %cst_14 : f32 to vector<128x128xf32>
    %31 = arith.maximumf %29, %30 : vector<128x128xf32>
    %32 = arith.addf %25, %31 : vector<128x128xf32>
    %33 = arith.truncf %32 : vector<128x128xf32> to vector<128x128xbf16>
    %c0_15 = arith.constant 0 : index
    %c0_16 = arith.constant 0 : index
    %34 = vector.load %arg4[%c0_15, %c0_16] : memref<128x128xbf16, #tpu.memory_space<vmem>>, vector<128x128xbf16>
    %cst_17 = arith.constant dense<0.000000e+00> : vector<128x128xf32>
    %35 = tpu.matmul %33, %34, %cst_17 {dimension_numbers = #tpu.dot_dimension_numbers<[1], [0], [0], [1], [0, 0, 1, 1], [], []>} : vector<128x128xbf16>, vector<128x128xbf16>, vector<128x128xf32> -> vector<128x128xf32>
    %c0_18 = arith.constant 0 : index
    %c0_19 = arith.constant 0 : index
    %36 = vector.load %arg5[%c0_18, %c0_19] : memref<128x128xf32, #tpu.memory_space<vmem>>, vector<128x128xf32>
    tpu.vector_store %arg5[%c0_18, %c0_19], %35 {strides = array<i32>} : memref<128x128xf32, #tpu.memory_space<vmem>>, vector<128x128xf32>,
    return
  }
  func.func @transform_0(%arg0: i32) -> (i32, i32, i32) {
    %c0_i32 = arith.constant 0 : i32
    %c0_i32_0 = arith.constant 0 : i32
    %c0_i32_1 = arith.constant 0 : i32
    return %c0_i32, %arg0, %c0_i32_0 : i32, i32, i32
  }
  func.func @transform_1(%arg0: i32) -> (i32, i32) {
    %c0_i32 = arith.constant 0 : i32
    %c0_i32_0 = arith.constant 0 : i32
    %c0_i32_1 = arith.constant 0 : i32
    return %c0_i32, %c0_i32_0 : i32, i32
  }
  func.func @transform_2(%arg0: i32) -> (i32, i32) {
    %c0_i32 = arith.constant 0 : i32
    %c0_i32_0 = arith.constant 0 : i32
    %c0_i32_1 = arith.constant 0 : i32
    return %c0_i32, %c0_i32_0 : i32, i32
  }
  func.func @transform_3(%arg0: i32) -> (i32, i32) {
    %c0_i32 = arith.constant 0 : i32
    %c0_i32_0 = arith.constant 0 : i32
    %c0_i32_1 = arith.constant 0 : i32
    return %c0_i32, %c0_i32_0 : i32, i32
  }
  func.func @transform_4(%arg0: i32) -> (i32, i32) {
    %c0_i32 = arith.constant 0 : i32
    %c0_i32_0 = arith.constant 0 : i32
    return %arg0, %c0_i32 : i32, i32
  }
}

</mosaic_0001>

<bundles_post_ra>
// kernel: tpu_custom_call.1
= control target key start
LH: loop header
LB: loop body
LE: loop exit
PB: predicated region body
PF: predicated region fallthrough
CT: control target
= control target key end

     0   :  { %9 = vsyncpa [#allocation3], 0  ;;  %s944_s0 = inlined_call_operand.hbm [shape: f32[4,128,128], index: 0, kind: input, shape index: {}]   ;;  %s945_s1 = inlined_call_operand.vmem [shape: f32[1,128], index: 1, kind: input, shape index: {}]   ;;  %s946_s2 = inlined_call_operand.vmem [shape: f32[1,128], index: 2, kind: input, shape index: {}]   ;;  %s947_s3 = inlined_call_operand.hbm [shape: bf16[128,128], index: 3, kind: input, shape index: {}]   ;;  %s948_s4 = inlined_call_operand.hbm [shape: f32[128,128], index: 4, kind: output, shape index: {}]  }
   0x1   :  { %10 = vsyncpa [#allocation6], 0 }
   0x2   :  { %11 = vsyncpa [#allocation4], 0  ;;  %s732_s15 = smov [#allocation2]   ;;  %s660_s19 = scalar_lea.hbm %s944_s0, 8192 }
   0x3   :  { %s17_s16 = sshll.u32 %s732_s15, 4  ;;  %p661_p0 = scmp.ne.s32.totalorder %s944_s0, %s660_s19  ;;  %s18_s16 = int_to_ptr.vmem [resolvable:$true] %s17_s16 }
   0x4   :  { %p664_p1 = scmp.lt.u32.totalorder %s660_s19, %s944_s0 }
   0x6   :  { %p666_p2 = pnand %p664_p1, %p661_p0 }
   0x8   :  { %669 = shalt.err (!%p666_p2)
}
   0x9   :  { %s670_s24 = scalar_lea.vmem %s18_s16, 8192  ;;  %p675_p4 = scmp.lt.s32.totalorder %s18_s16, %s18_s16 }
   0xa   :  { %p671_p3 = scmp.ne.s32.totalorder %s18_s16, %s670_s24  ;;  %p676_p5 = scmp.lt.s32.totalorder %s670_s24, %s670_s24 }
   0xc   :  { %p677_p6 = por %p676_p5, %p675_p4 }
   0xe   :  { %p678_p7 = pnand %p677_p6, %p671_p3 }
  0x10   :  { %681 = shalt.err (!%p678_p7)
}
  0x11   :  { %s733_s25 = smov 128   ;;  %s734_s26 = smov 8  }
  0x12   :  { %23 = dma.hbm_to_vmem [thread:$0]  %s944_s0, 8192, %s18_s16, [#allocation3], %s733_s25, %s733_s25, %s734_s26  }
  0x13   :  { %s735_s29 = smov [#allocation5]   ;;  %s682_s7 = scalar_lea.hbm %s947_s3, 1024 }
  0x14   :  { %s33_s30 = sshll.u32 %s735_s29, 4  ;;  %p683_p8 = scmp.ne.s32.totalorder %s947_s3, %s682_s7  ;;  %s34_s30 = int_to_ptr.vmem [resolvable:$true] %s33_s30 }
  0x15   :  { %p686_p9 = scmp.lt.u32.totalorder %s682_s7, %s947_s3 }
  0x17   :  { %p688_p10 = pnand %p686_p9, %p683_p8 }
  0x19   :  { %691 = shalt.err (!%p688_p10)
}
  0x1a   :  { %s692_s12 = scalar_lea.vmem %s34_s30, 1024  ;;  %p697_p12 = scmp.lt.s32.totalorder %s34_s30, %s34_s30 }
  0x1b   :  { %p693_p11 = scmp.ne.s32.totalorder %s34_s30, %s692_s12  ;;  %p698_p13 = scmp.lt.s32.totalorder %s692_s12, %s692_s12 }
  0x1d   :  { %p699_p0 = por %p698_p13, %p697_p12 }
  0x1f   :  { %p700_p1 = pnand %p699_p0, %p693_p11 }
  0x21   :  { %703 = shalt.err (!%p700_p1)
}
  0x22   :  { %s736_s0 = smov 64   ;;  %s737_s13 = smov 4  }
  0x23   :  { %39 = dma.hbm_to_vmem [thread:$0]  %s947_s3, 1024, %s34_s30, [#allocation6], %s736_s0, %s736_s0, %s737_s13  }
  0x24   :  { %726 = dma.done.wait [#allocation3], 8192  }
  0x25   :  { %727 = vsyncadd [#allocation3], 4294959104 }
  0x26   :  { %728 = dma.done.wait [#allocation6], 1024  }
  0x27   :  { %729 = vsyncadd [#allocation6], 4294966272  ;;  %v652_v0 = vld [vmem:[#allocation5] sm:$0xff]   ;;  %v653_v1 = vld [vmem:[#allocation5 + $0x8] sm:$0xff]  }
  0x28   :  { %597 = vmatprep.subr.bf16.mxu0 %v652_v0  ;;  %629 = vmatprep.subr.bf16.mxu1 %v652_v0  ;;  %v654_v2 = vld [vmem:[#allocation5 + $0x10] sm:$0xff]   ;;  %v655_v3 = vld [vmem:[#allocation5 + $0x18] sm:$0xff]   ;;  %v794_v4 = vld [vmem:[%s945_s1] ss:$0 sm:$0xff]  ;;  %s738_s1 = smov [#allocation7]  }
  0x29   :  { %598 = vmatpush3.bf16.msra.mxu0 %v652_v0  ;;  %637 = vmatpush3.bf16.msra.mxu1 %v652_v0  ;;  %v799_v5 = vld [vmem:[%s946_s2] ss:$0 sm:$0xff]  ;;  %v62_v7 = vld [vmem:[#allocation2 + $0x8] sm:$0xff]  ;;  %v658_v61 = vld [vmem:[#allocation5 + $0x30] sm:$0xff]   ;;  %s558_s2 = sshll.u32 %s738_s1, 4  ;;  %s559_s2 = int_to_ptr.vmem [resolvable:$true] %s558_s2 }
  0x2a   :  { %599 = vmatprep.subr.bf16.mxu0 %v653_v1  ;;  %630 = vmatprep.subr.bf16.mxu1 %v653_v1  ;;  %v61_v6 = vld [vmem:[#allocation2] sm:$0xff]  ;;  %v127_v10 = vld [vmem:[#allocation2 + $0x88] sm:$0xff]  ;;  %v78_v11 = vmul.f32 %v794_v4, %v62_v7  ;;  %s704_s19 = scalar_lea.vmem %s559_s2, 2048  ;;  %p709_p3 = scmp.lt.s32.totalorder %s559_s2, %s559_s2 }
  0x2b   :  { %v77_v8 = vmul.f32 %v794_v4, %v61_v6  ;;  %v126_v9 = vld [vmem:[#allocation2 + $0x80] sm:$0xff]  ;;  %v143_v13 = vmul.f32 %v794_v4, %v127_v10  ;;  %v208_v15 = vld [vmem:[#allocation2 + $0x108] sm:$0xff]  ;;  %p705_p2 = scmp.ne.s32.totalorder %s559_s2, %s704_s19  ;;  %p710_p4 = scmp.lt.s32.totalorder %s704_s19, %s704_s19 }
  0x2c   :  { %v142_v12 = vmul.f32 %v794_v4, %v126_v9  ;;  %v207_v14 = vld [vmem:[#allocation2 + $0x100] sm:$0xff]  ;;  %v224_v19 = vmul.f32 %v794_v4, %v208_v15  ;;  %v289_v20 = vld [vmem:[#allocation2 + $0x188] sm:$0xff]  ;;  %v94_v22 = vadd.f32 %v799_v5, %v78_v11 }
  0x2d   :  { %600 = vmatpush3.bf16.msra.mxu0 %v653_v1  ;;  %638 = vmatpush3.bf16.msra.mxu1 %v653_v1  ;;  %v288_v16 = vld [vmem:[#allocation2 + $0x180] sm:$0xff]  ;;  %v93_v17 = vadd.f32 %v799_v5, %v77_v8  ;;  %v223_v18 = vmul.f32 %v794_v4, %v207_v14  ;;  %v159_v24 = vadd.f32 %v799_v5, %v143_v13  ;;  %v70_v34 = vld [vmem:[#allocation2 + $0x48] sm:$0xff]  ;;  %v63_v1 = vld [vmem:[#allocation2 + $0x10] sm:$0xff]  ;;  %p711_p5 = por %p710_p4, %p709_p3 }
  0x2e   :  { %601 = vmatprep.subr.bf16.mxu0 %v654_v2  ;;  %631 = vmatprep.subr.bf16.mxu1 %v654_v2  ;;  %v656_v21 = vld [vmem:[#allocation5 + $0x20] sm:$0xff]   ;;  %v158_v23 = vadd.f32 %v799_v5, %v142_v12  ;;  %v240_v28 = vadd.f32 %v799_v5, %v224_v19  ;;  %v304_v29 = vmul.f32 %v794_v4, %v288_v16  ;;  %v110_v30 = vmax.f32 %v94_v22, 0.0  ;;  %v135_v40 = vld [vmem:[#allocation2 + $0xc8] sm:$0xff]  ;;  %v64_v12 = vld [vmem:[#allocation2 + $0x18] sm:$0xff] }
  0x2f   :  { %v69_v25 = vld [vmem:[#allocation2 + $0x40] sm:$0xff]  ;;  %v109_v26 = vmax.f32 %v93_v17, 0.0  ;;  %v239_v27 = vadd.f32 %v799_v5, %v223_v18  ;;  %v175_v32 = vmax.f32 %v159_v24, 0.0  ;;  %v305_v33 = vmul.f32 %v794_v4, %v289_v20  ;;  %v657_v41 = vld [vmem:[#allocation5 + $0x28] sm:$0xff]   ;;  %v128_v17 = vld [vmem:[#allocation2 + $0x90] sm:$0xff]  ;;  %p712_p6 = pnand %p711_p5, %p705_p2 }
  0x30   :  { %v174_v31 = vmax.f32 %v158_v23, 0.0  ;;  %v134_v35 = vld [vmem:[#allocation2 + $0xc0] sm:$0xff]  ;;  %v256_v37 = vmax.f32 %v240_v28, 0.0  ;;  %v320_v38 = vadd.f32 %v799_v5, %v304_v29  ;;  %v85_v39 = vmul.f32 %v794_v4, %v69_v25  ;;  %v216_v54 = vld [vmem:[#allocation2 + $0x148] sm:$0xff]  ;;  %v129_v18 = vld [vmem:[#allocation2 + $0x98] sm:$0xff] }
  0x31   :  { %602 = vmatpush3.bf16.msra.mxu0 %v654_v2  ;;  %639 = vmatpush3.bf16.msra.mxu1 %v654_v2  ;;  %v255_v36 = vmax.f32 %v239_v27, 0.0  ;;  %v191_v43 = vadd.f32 %v175_v32, %v110_v30  ;;  %v321_v44 = vadd.f32 %v799_v5, %v305_v33  ;;  %v215_v45 = vld [vmem:[#allocation2 + $0x140] sm:$0xff]  ;;  %v86_v47 = vmul.f32 %v794_v4, %v70_v34  ;;  %v297_v60 = vld [vmem:[#allocation2 + $0x1c8] sm:$0xff]  ;;  %v659_v19 = vld [vmem:[#allocation5 + $0x38] sm:$0xff]  }
  0x32   :  { %603 = vmatprep.subr.bf16.mxu0 %v655_v3  ;;  %632 = vmatprep.subr.bf16.mxu1 %v655_v3  ;;  %v190_v42 = vadd.f32 %v174_v31, %v109_v26  ;;  %v336_v46 = vmax.f32 %v320_v38, 0.0  ;;  %v101_v48 = vadd.f32 %v799_v5, %v85_v39  ;;  %v150_v49 = vmul.f32 %v794_v4, %v134_v35  ;;  %v296_v59 = vld [vmem:[#allocation2 + $0x1c0] sm:$0xff]  ;;  %v209_v23 = vld [vmem:[#allocation2 + $0x110] sm:$0xff]  ;;  %v210_v32 = vld [vmem:[#allocation2 + $0x118] sm:$0xff] }
  0x33   :  { %v272_v51 = vadd.f32 %v256_v37, %v191_v43  ;;  %v337_v52 = vmax.f32 %v321_v44, 0.0  ;;  %v151_v53 = vmul.f32 %v794_v4, %v135_v40  ;;  %v102_v55 = vadd.f32 %v799_v5, %v86_v47  ;;  %v291_v37 = vld [vmem:[#allocation2 + $0x198] sm:$0xff] }
  0x34   :  { %v271_v50 = vadd.f32 %v255_v36, %v190_v42  ;;  %v117_v56 = vmax.f32 %v101_v48, 0.0  ;;  %v166_v57 = vadd.f32 %v799_v5, %v150_v49  ;;  %v231_v58 = vmul.f32 %v794_v4, %v215_v45  ;;  %v290_v36 = vld [vmem:[#allocation2 + $0x190] sm:$0xff] }
  0x35   :  { %604 = vmatpush3.bf16.msra.mxu0 %v655_v3  ;;  %640 = vmatpush3.bf16.msra.mxu1 %v655_v3  ;;  %v353_v63 = vadd.f32 %v337_v52, %v272_v51  ;;  %v167_v0 = vadd.f32 %v799_v5, %v151_v53  ;;  %v118_v2 = vmax.f32 %v102_v55, 0.0  ;;  %v232_v6 = vmul.f32 %v794_v4, %v216_v54  ;;  %v71_v42 = vld [vmem:[#allocation2 + $0x50] sm:$0xff]  ;;  %v72_v51 = vld [vmem:[#allocation2 + $0x58] sm:$0xff] }
  0x36   :  { %605 = vmatprep.subr.bf16.mxu0 %v656_v21  ;;  %633 = vmatprep.subr.bf16.mxu1 %v656_v21  ;;  %v352_v62 = vadd.f32 %v336_v46, %v271_v50  ;;  %v182_v3 = vmax.f32 %v166_v57, 0.0  ;;  %v247_v7 = vadd.f32 %v799_v5, %v231_v58  ;;  %v312_v10 = vmul.f32 %v794_v4, %v296_v59  ;;  %v136_v52 = vld [vmem:[#allocation2 + $0xd0] sm:$0xff]  ;;  %v137_v57 = vld [vmem:[#allocation2 + $0xd8] sm:$0xff] }
  0x37   :  { %v183_v9 = vmax.f32 %v167_v0, 0.0  ;;  %v313_v11 = vmul.f32 %v794_v4, %v297_v60  ;;  %v248_v14 = vadd.f32 %v799_v5, %v232_v6  ;;  %v79_v16 = vmul.f32 %v794_v4, %v63_v1 }
  0x38   :  { %v368_v8 = vpack.c.bf16 %v353_v63, %v352_v62  ;;  %v198_v13 = vadd.f32 %v182_v3, %v117_v56  ;;  %v263_v15 = vmax.f32 %v247_v7, 0.0  ;;  %v80_v26 = vmul.f32 %v794_v4, %v64_v12  ;;  %v218_v3 = vld [vmem:[#allocation2 + $0x158] sm:$0xff] }
  0x39   :  { %606 = vmatpush3.bf16.msra.mxu0 %v656_v21  ;;  %641 = vmatpush3.bf16.msra.mxu1 %v656_v21  ;;  %v199_v20 = vadd.f32 %v183_v9, %v118_v2  ;;  %v328_v21 = vadd.f32 %v799_v5, %v312_v10  ;;  %v329_v22 = vadd.f32 %v799_v5, %v313_v11  ;;  %v264_v24 = vmax.f32 %v248_v14, 0.0  ;;  %v217_v2 = vld [vmem:[#allocation2 + $0x150] sm:$0xff] }
  0x3a   :  { %607 = vmatprep.subr.bf16.mxu0 %v657_v41  ;;  %634 = vmatprep.subr.bf16.mxu1 %v657_v41  ;;  %v279_v25 = vadd.f32 %v263_v15, %v198_v13  ;;  %v95_v27 = vadd.f32 %v799_v5, %v79_v16  ;;  %v144_v30 = vmul.f32 %v794_v4, %v128_v17  ;;  %v298_v10 = vld [vmem:[#allocation2 + $0x1d0] sm:$0xff]  ;;  %v299_v15 = vld [vmem:[#allocation2 + $0x1d8] sm:$0xff] }
  0x3b   :  { %613 = vmatprep.mubr.bf16.mxu0 %v368_v8  ;;  %v344_v28 = vmax.f32 %v328_v21, 0.0  ;;  %v345_v29 = vmax.f32 %v329_v22, 0.0  ;;  %v145_v31 = vmul.f32 %v794_v4, %v129_v18  ;;  %v280_v33 = vadd.f32 %v264_v24, %v199_v20  ;;  %v65_v20 = vld [vmem:[#allocation2 + $0x20] sm:$0xff] }
  0x3c   :  { %v96_v34 = vadd.f32 %v799_v5, %v80_v26  ;;  %v225_v35 = vmul.f32 %v794_v4, %v209_v23  ;;  %v111_v39 = vmax.f32 %v95_v27, 0.0  ;;  %v160_v40 = vadd.f32 %v799_v5, %v144_v30  ;;  %v130_v30 = vld [vmem:[#allocation2 + $0xa0] sm:$0xff] }
  0x3d   :  { %608 = vmatpush3.bf16.msra.mxu0 %v657_v41  ;;  %642 = vmatpush3.bf16.msra.mxu1 %v657_v41  ;;  %v360_v38 = vadd.f32 %v344_v28, %v279_v25  ;;  %v161_v41 = vadd.f32 %v799_v5, %v145_v31  ;;  %v361_v43 = vadd.f32 %v345_v29, %v280_v33  ;;  %v66_v29 = vld [vmem:[#allocation2 + $0x28] sm:$0xff] }
  0x3e   :  { %609 = vmatprep.subr.bf16.mxu0 %v658_v61  ;;  %635 = vmatprep.subr.bf16.mxu1 %v658_v61  ;;  %v112_v44 = vmax.f32 %v96_v34, 0.0  ;;  %v226_v45 = vmul.f32 %v794_v4, %v210_v32  ;;  %v241_v46 = vadd.f32 %v799_v5, %v225_v35  ;;  %v176_v47 = vmax.f32 %v160_v40, 0.0  ;;  %v131_v35 = vld [vmem:[#allocation2 + $0xa8] sm:$0xff]  ;;  %v211_v40 = vld [vmem:[#allocation2 + $0x120] sm:$0xff] }
  0x3f   :  { %v177_v48 = vmax.f32 %v161_v41, 0.0  ;;  %v306_v49 = vmul.f32 %v794_v4, %v290_v36  ;;  %v307_v50 = vmul.f32 %v794_v4, %v291_v37  ;;  %v372_v53 = vpack.c.bf16 %v361_v43, %v360_v38 }
  0x40   :  { %v242_v54 = vadd.f32 %v799_v5, %v226_v45  ;;  %v257_v55 = vmax.f32 %v241_v46, 0.0  ;;  %v87_v56 = vmul.f32 %v794_v4, %v71_v42  ;;  %v192_v58 = vadd.f32 %v176_v47, %v111_v39  ;;  %v212_v45 = vld [vmem:[#allocation2 + $0x128] sm:$0xff] }
  0x41   :  { %610 = vmatpush3.bf16.msra.mxu0 %v658_v61  ;;  %643 = vmatpush3.bf16.msra.mxu1 %v658_v61  ;;  %v193_v59 = vadd.f32 %v177_v48, %v112_v44  ;;  %v322_v60 = vadd.f32 %v799_v5, %v306_v49  ;;  %v323_v61 = vadd.f32 %v799_v5, %v307_v50  ;;  %v292_v50 = vld [vmem:[#allocation2 + $0x1a0] sm:$0xff] }
  0x42   :  { %611 = vmatprep.subr.bf16.mxu0 %v659_v19  ;;  %636 = vmatprep.subr.bf16.mxu1 %v659_v19  ;;  %v258_v62 = vmax.f32 %v242_v54, 0.0  ;;  %v88_v63 = vmul.f32 %v794_v4, %v72_v51  ;;  %v103_v0 = vadd.f32 %v799_v5, %v87_v56  ;;  %v152_v1 = vmul.f32 %v794_v4, %v136_v52 }
  0x43   :  { %621 = vmatprep.mubr.bf16.mxu1 %v372_v53  ;;  %v273_v6 = vadd.f32 %v257_v55, %v192_v58  ;;  %v338_v7 = vmax.f32 %v322_v60, 0.0  ;;  %v339_v8 = vmax.f32 %v323_v61, 0.0  ;;  %v153_v9 = vmul.f32 %v794_v4, %v137_v57  ;;  %v293_v55 = vld [vmem:[#allocation2 + $0x1a8] sm:$0xff]  ;;  %v73_v60 = vld [vmem:[#allocation2 + $0x60] sm:$0xff] }
  0x44   :  { %v274_v11 = vadd.f32 %v258_v62, %v193_v59  ;;  %v104_v12 = vadd.f32 %v799_v5, %v88_v63  ;;  %v119_v13 = vmax.f32 %v103_v0, 0.0  ;;  %v168_v14 = vadd.f32 %v799_v5, %v152_v1  ;;  %v74_v1 = vld [vmem:[#allocation2 + $0x68] sm:$0xff] }
  0x45   :  { %612 = vmatpush3.bf16.msra.mxu0 %v659_v19  ;;  %644 = vmatpush3.bf16.msra.mxu1 %v659_v19  ;;  %v354_v16 = vadd.f32 %v338_v7, %v273_v6  ;;  %v169_v17 = vadd.f32 %v799_v5, %v153_v9  ;;  %v233_v18 = vmul.f32 %v794_v4, %v217_v2 }
  0x46   :  { %v234_v19 = vmul.f32 %v794_v4, %v218_v3  ;;  %v355_v21 = vadd.f32 %v339_v8, %v274_v11  ;;  %v120_v22 = vmax.f32 %v104_v12, 0.0  ;;  %v184_v23 = vmax.f32 %v168_v14, 0.0  ;;  %v138_v8 = vld [vmem:[#allocation2 + $0xe0] sm:$0xff] }
  0x47   :  { %v314_v24 = vmul.f32 %v794_v4, %v298_v10  ;;  %v185_v25 = vmax.f32 %v169_v17, 0.0  ;;  %v249_v26 = vadd.f32 %v799_v5, %v233_v18  ;;  %v315_v28 = vmul.f32 %v794_v4, %v299_v15  ;;  %v219_v18 = vld [vmem:[#allocation2 + $0x160] sm:$0xff] }
  0x48   :  { %v250_v27 = vadd.f32 %v799_v5, %v234_v19  ;;  %v369_v31 = vpack.c.bf16 %v355_v21, %v354_v16  ;;  %v200_v32 = vadd.f32 %v184_v23, %v119_v13  ;;  %v81_v34 = vmul.f32 %v794_v4, %v65_v20  ;;  %v139_v13 = vld [vmem:[#allocation2 + $0xe8] sm:$0xff] }
  0x49   :  { %v330_v33 = vadd.f32 %v799_v5, %v314_v24  ;;  %v201_v36 = vadd.f32 %v185_v25, %v120_v22  ;;  %v265_v37 = vmax.f32 %v249_v26, 0.0  ;;  %v331_v39 = vadd.f32 %v799_v5, %v315_v28  ;;  %v220_v23 = vld [vmem:[#allocation2 + $0x168] sm:$0xff]  ;;  %v300_v28 = vld [vmem:[#allocation2 + $0x1e0] sm:$0xff] }
  0x4a   :  { %v266_v38 = vmax.f32 %v250_v27, 0.0  ;;  %614 = vmatmul.mubr.bf16.vlgmr.msra.gmra.mrb[0].mxu0 %v369_v31  ;;  %v82_v42 = vmul.f32 %v794_v4, %v66_v29  ;;  %v97_v43 = vadd.f32 %v799_v5, %v81_v34  ;;  %v146_v44 = vmul.f32 %v794_v4, %v130_v30  ;;  %v301_v29 = vld [vmem:[#allocation2 + $0x1e8] sm:$0xff]  ;;  %v67_v34 = vld [vmem:[#allocation2 + $0x30] sm:$0xff] }
  0x4b   :  { %v346_v41 = vmax.f32 %v330_v33, 0.0  ;;  %v281_v46 = vadd.f32 %v265_v37, %v200_v32  ;;  %v347_v48 = vmax.f32 %v331_v39, 0.0  ;;  %v147_v49 = vmul.f32 %v794_v4, %v131_v35 }
  0x4c   :  { %v282_v47 = vadd.f32 %v266_v38, %v201_v36  ;;  %v98_v51 = vadd.f32 %v799_v5, %v82_v42  ;;  %v113_v52 = vmax.f32 %v97_v43, 0.0  ;;  %v162_v53 = vadd.f32 %v799_v5, %v146_v44  ;;  %v68_v43 = vld [vmem:[#allocation2 + $0x38] sm:$0xff] }
  0x4d   :  { %v227_v54 = vmul.f32 %v794_v4, %v211_v40  ;;  %v362_v56 = vadd.f32 %v346_v41, %v281_v46  ;;  %v163_v58 = vadd.f32 %v799_v5, %v147_v49  ;;  %v228_v59 = vmul.f32 %v794_v4, %v212_v45 }
  0x4e   :  { %v363_v57 = vadd.f32 %v347_v48, %v282_v47  ;;  %v114_v61 = vmax.f32 %v98_v51, 0.0  ;;  %v178_v62 = vmax.f32 %v162_v53, 0.0  ;;  %v308_v0 = vmul.f32 %v794_v4, %v292_v50  ;;  %v132_v48 = vld [vmem:[#allocation2 + $0xb0] sm:$0xff]  ;;  %v133_v53 = vld [vmem:[#allocation2 + $0xb8] sm:$0xff] }
  0x4f   :  { %v243_v63 = vadd.f32 %v799_v5, %v227_v54  ;;  %v179_v3 = vmax.f32 %v163_v58, 0.0  ;;  %v244_v6 = vadd.f32 %v799_v5, %v228_v59  ;;  %v309_v7 = vmul.f32 %v794_v4, %v293_v55  ;;  %v213_v58 = vld [vmem:[#allocation2 + $0x130] sm:$0xff]  ;;  %v214_v59 = vld [vmem:[#allocation2 + $0x138] sm:$0xff] }
  0x50   :  { %v373_v2 = vpack.c.bf16 %v363_v57, %v362_v56  ;;  %v194_v9 = vadd.f32 %v178_v62, %v113_v52  ;;  %v324_v11 = vadd.f32 %v799_v5, %v308_v0  ;;  %v89_v12 = vmul.f32 %v794_v4, %v73_v60  ;;  %v294_v0 = vld [vmem:[#allocation2 + $0x1b0] sm:$0xff] }
  0x51   :  { %v259_v10 = vmax.f32 %v243_v63, 0.0  ;;  %v195_v14 = vadd.f32 %v179_v3, %v114_v61  ;;  %v260_v15 = vmax.f32 %v244_v6, 0.0  ;;  %v325_v16 = vadd.f32 %v799_v5, %v309_v7  ;;  %v295_v7 = vld [vmem:[#allocation2 + $0x1b8] sm:$0xff] }
  0x52   :  { %622 = vmatmul.mubr.bf16.vlgmr.msra.gmra.mrb[0].mxu1 %v373_v2  ;;  %v90_v17 = vmul.f32 %v794_v4, %v74_v1  ;;  %v340_v20 = vmax.f32 %v324_v11, 0.0  ;;  %v105_v21 = vadd.f32 %v799_v5, %v89_v12  ;;  %v154_v22 = vmul.f32 %v794_v4, %v138_v8  ;;  %v75_v12 = vld [vmem:[#allocation2 + $0x70] sm:$0xff] }
  0x53   :  { %v275_v19 = vadd.f32 %v259_v10, %v194_v9  ;;  %v276_v24 = vadd.f32 %v260_v15, %v195_v14  ;;  %v341_v25 = vmax.f32 %v325_v16, 0.0  ;;  %v155_v27 = vmul.f32 %v794_v4, %v139_v13 }
  0x54   :  { %v106_v26 = vadd.f32 %v799_v5, %v90_v17  ;;  %v121_v31 = vmax.f32 %v105_v21, 0.0  ;;  %v170_v32 = vadd.f32 %v799_v5, %v154_v22  ;;  %v235_v33 = vmul.f32 %v794_v4, %v219_v18  ;;  %v76_v21 = vld [vmem:[#allocation2 + $0x78] sm:$0xff] }
  0x55   :  { %v356_v30 = vadd.f32 %v340_v20, %v275_v19  ;;  %v357_v35 = vadd.f32 %v341_v25, %v276_v24  ;;  %v171_v37 = vadd.f32 %v799_v5, %v155_v27  ;;  %v236_v38 = vmul.f32 %v794_v4, %v220_v23  ;;  %v141_v27 = vld [vmem:[#allocation2 + $0xf8] sm:$0xff] }
  0x56   :  { %v122_v36 = vmax.f32 %v106_v26, 0.0  ;;  %v186_v39 = vmax.f32 %v170_v32, 0.0  ;;  %v251_v40 = vadd.f32 %v799_v5, %v235_v33  ;;  %v316_v41 = vmul.f32 %v794_v4, %v300_v28  ;;  %v140_v26 = vld [vmem:[#allocation2 + $0xf0] sm:$0xff] }
  0x57   :  { %v317_v42 = vmul.f32 %v794_v4, %v301_v29  ;;  %v370_v44 = vpack.c.bf16 %v357_v35, %v356_v30  ;;  %v187_v45 = vmax.f32 %v171_v37, 0.0  ;;  %v252_v46 = vadd.f32 %v799_v5, %v236_v38  ;;  %v221_v32 = vld [vmem:[#allocation2 + $0x170] sm:$0xff]  ;;  %v222_v37 = vld [vmem:[#allocation2 + $0x178] sm:$0xff] }
  0x58   :  { %v83_v47 = vmul.f32 %v794_v4, %v67_v34  ;;  %v202_v49 = vadd.f32 %v186_v39, %v121_v31  ;;  %v267_v50 = vmax.f32 %v251_v40, 0.0  ;;  %v332_v51 = vadd.f32 %v799_v5, %v316_v41 }
  0x59   :  { %v333_v52 = vadd.f32 %v799_v5, %v317_v42  ;;  %617 = vmatprep.mubr.bf16.mxu0 %v370_v44  ;;  %v203_v54 = vadd.f32 %v187_v45, %v122_v36  ;;  %v268_v55 = vmax.f32 %v252_v46, 0.0  ;;  %v84_v56 = vmul.f32 %v794_v4, %v68_v43  ;;  %v302_v42 = vld [vmem:[#allocation2 + $0x1f0] sm:$0xff] }
  0x5a   :  { %v99_v57 = vadd.f32 %v799_v5, %v83_v47  ;;  %v283_v60 = vadd.f32 %v267_v50, %v202_v49  ;;  %v348_v61 = vmax.f32 %v332_v51, 0.0  ;;  %v148_v63 = vmul.f32 %v794_v4, %v132_v48  ;;  %v303_v47 = vld [vmem:[#allocation2 + $0x1f8] sm:$0xff] }
  0x5b   :  { %v349_v62 = vmax.f32 %v333_v52, 0.0  ;;  %v284_v1 = vadd.f32 %v268_v55, %v203_v54  ;;  %v100_v2 = vadd.f32 %v799_v5, %v84_v56  ;;  %v149_v6 = vmul.f32 %v794_v4, %v133_v53 }
  0x5c   :  { %v115_v3 = vmax.f32 %v99_v57, 0.0  ;;  %v364_v8 = vadd.f32 %v348_v61, %v283_v60  ;;  %v164_v9 = vadd.f32 %v799_v5, %v148_v63  ;;  %v229_v10 = vmul.f32 %v794_v4, %v213_v58 }
  0x5d   :  { %v230_v11 = vmul.f32 %v794_v4, %v214_v59  ;;  %v365_v13 = vadd.f32 %v349_v62, %v284_v1  ;;  %v116_v14 = vmax.f32 %v100_v2, 0.0  ;;  %v165_v15 = vadd.f32 %v799_v5, %v149_v6 }
  0x5e   :  { %v310_v16 = vmul.f32 %v794_v4, %v294_v0  ;;  %v180_v17 = vmax.f32 %v164_v9, 0.0  ;;  %v245_v18 = vadd.f32 %v799_v5, %v229_v10  ;;  %v311_v20 = vmul.f32 %v794_v4, %v295_v7 }
  0x5f   :  { %v246_v19 = vadd.f32 %v799_v5, %v230_v11  ;;  %v374_v22 = vpack.c.bf16 %v365_v13, %v364_v8  ;;  %v181_v23 = vmax.f32 %v165_v15, 0.0  ;;  %v91_v25 = vmul.f32 %v794_v4, %v75_v12 }
  0x60   :  { %v326_v24 = vadd.f32 %v799_v5, %v310_v16  ;;  %v196_v28 = vadd.f32 %v180_v17, %v115_v3  ;;  %v261_v29 = vmax.f32 %v245_v18, 0.0  ;;  %v327_v31 = vadd.f32 %v799_v5, %v311_v20 }
  0x61   :  { %v262_v30 = vmax.f32 %v246_v19, 0.0  ;;  %625 = vmatprep.mubr.bf16.mxu1 %v374_v22  ;;  %v197_v33 = vadd.f32 %v181_v23, %v116_v14  ;;  %v92_v35 = vmul.f32 %v794_v4, %v76_v21  ;;  %v107_v36 = vadd.f32 %v799_v5, %v91_v25 }
  0x62   :  { %v342_v34 = vmax.f32 %v326_v24, 0.0  ;;  %v277_v38 = vadd.f32 %v261_v29, %v196_v28  ;;  %v343_v39 = vmax.f32 %v327_v31, 0.0  ;;  %v156_v40 = vmul.f32 %v794_v4, %v140_v26 }
  0x63   :  { %v157_v41 = vmul.f32 %v794_v4, %v141_v27  ;;  %v278_v43 = vadd.f32 %v262_v30, %v197_v33  ;;  %v108_v44 = vadd.f32 %v799_v5, %v92_v35  ;;  %v123_v45 = vmax.f32 %v107_v36, 0.0 }
  0x64   :  { %v237_v46 = vmul.f32 %v794_v4, %v221_v32  ;;  %v358_v48 = vadd.f32 %v342_v34, %v277_v38  ;;  %v172_v49 = vadd.f32 %v799_v5, %v156_v40  ;;  %v238_v51 = vmul.f32 %v794_v4, %v222_v37 }
  0x65   :  { %v173_v50 = vadd.f32 %v799_v5, %v157_v41  ;;  %v359_v52 = vadd.f32 %v343_v39, %v278_v43  ;;  %v124_v53 = vmax.f32 %v108_v44, 0.0  ;;  %v318_v55 = vmul.f32 %v794_v4, %v302_v42 }
  0x66   :  { %v253_v54 = vadd.f32 %v799_v5, %v237_v46  ;;  %v188_v56 = vmax.f32 %v172_v49, 0.0  ;;  %v254_v58 = vadd.f32 %v799_v5, %v238_v51  ;;  %v319_v59 = vmul.f32 %v794_v4, %v303_v47 }
  0x67   :  { %v189_v57 = vmax.f32 %v173_v50, 0.0  ;;  %v371_v60 = vpack.c.bf16 %v359_v52, %v358_v48  ;;  %v334_v62 = vadd.f32 %v799_v5, %v318_v55 }
  0x68   :  { %v269_v61 = vmax.f32 %v253_v54, 0.0  ;;  %v204_v63 = vadd.f32 %v188_v56, %v123_v45  ;;  %v270_v1 = vmax.f32 %v254_v58, 0.0  ;;  %v335_v2 = vadd.f32 %v799_v5, %v319_v59 }
  0x69   :  { %v205_v0 = vadd.f32 %v189_v57, %v124_v53  ;;  %618 = vmatmul.mubr.bf16.gmra.mrb[4].mxu0 %v371_v60  ;;  %v350_v3 = vmax.f32 %v334_v62, 0.0 }
  0x6a   :  { %v285_v6 = vadd.f32 %v269_v61, %v204_v63  ;;  %v351_v8 = vmax.f32 %v335_v2, 0.0 }
  0x6b   :  { %v286_v7 = vadd.f32 %v270_v1, %v205_v0 }
  0x6c   :  { %v366_v9 = vadd.f32 %v350_v3, %v285_v6 }
  0x6d   :  { %v367_v10 = vadd.f32 %v351_v8, %v286_v7 }
  0x6f   :  { %v375_v11 = vpack.c.bf16 %v367_v10, %v366_v9 }
  0x71   :  { %626 = vmatmul.mubr.bf16.gmra.mrb[4].mxu1 %v375_v11 }
 0x11d   :  { %v615_v12 = vpop.f32.mrb[0].mxu0 }
 0x11e   :  { %539 = vst [vmem:[#allocation7 + $0x10] sm:$0xff] %v615_v12  ;;  %v474_v4 = vpop.f32.mrb[1].mxu0 }
 0x11f   :  { %537 = vst [vmem:[#allocation7] sm:$0xff] %v474_v4  ;;  %v616_v13 = vpop.f32.mrb[2].mxu0 }
 0x120   :  { %540 = vst [vmem:[#allocation7 + $0x18] sm:$0xff] %v616_v13  ;;  %v477_v14 = vpop.f32.mrb[3].mxu0 }
 0x121   :  { %538 = vst [vmem:[#allocation7 + $0x8] sm:$0xff] %v477_v14 }
 0x125   :  { %v623_v15 = vpop.f32.mrb[0].mxu1 }
 0x126   :  { %547 = vst [vmem:[#allocation7 + $0x50] sm:$0xff] %v623_v15  ;;  %v506_v5 = vpop.f32.mrb[1].mxu1 }
 0x127   :  { %545 = vst [vmem:[#allocation7 + $0x40] sm:$0xff] %v506_v5  ;;  %v624_v16 = vpop.f32.mrb[2].mxu1 }
 0x128   :  { %548 = vst [vmem:[#allocation7 + $0x58] sm:$0xff] %v624_v16  ;;  %v509_v17 = vpop.f32.mrb[3].mxu1 }
 0x129   :  { %546 = vst [vmem:[#allocation7 + $0x48] sm:$0xff] %v509_v17 }
 0x13c   :  { %v619_v18 = vpop.f32.mrb[4].mxu0 }
 0x13d   :  { %543 = vst [vmem:[#allocation7 + $0x30] sm:$0xff] %v619_v18  ;;  %v490_v19 = vpop.f32.mrb[5].mxu0 }
 0x13e   :  { %541 = vst [vmem:[#allocation7 + $0x20] sm:$0xff] %v490_v19  ;;  %v620_v20 = vpop.f32.mrb[6].mxu0 }
 0x13f   :  { %544 = vst [vmem:[#allocation7 + $0x38] sm:$0xff] %v620_v20  ;;  %v493_v21 = vpop.f32.mrb[7].mxu0 }
 0x140   :  { %542 = vst [vmem:[#allocation7 + $0x28] sm:$0xff] %v493_v21 }
 0x144   :  { %v627_v22 = vpop.f32.mrb[4].mxu1 }
 0x145   :  { %551 = vst [vmem:[#allocation7 + $0x70] sm:$0xff] %v627_v22  ;;  %v522_v23 = vpop.f32.mrb[5].mxu1 }
 0x146   :  { %549 = vst [vmem:[#allocation7 + $0x60] sm:$0xff] %v522_v23  ;;  %v628_v24 = vpop.f32.mrb[6].mxu1 }
 0x147   :  { %552 = vst [vmem:[#allocation7 + $0x78] sm:$0xff] %v628_v24  ;;  %v525_v25 = vpop.f32.mrb[7].mxu1 }
 0x148   :  { %550 = vst [vmem:[#allocation7 + $0x68] sm:$0xff] %v525_v25 }
 0x149   :  { %715 = shalt.err (!%p712_p6)
}
 0x14a   :  { %s716_s22 = scalar_lea.hbm %s948_s4, 2048 }
 0x14b   :  { %p717_p7 = scmp.ne.s32.totalorder %s948_s4, %s716_s22  ;;  %p720_p8 = scmp.lt.u32.totalorder %s716_s22, %s948_s4 }
 0x14d   :  { %p722_p9 = pnand %p720_p8, %p717_p7 }
 0x14f   :  { %725 = shalt.err (!%p722_p9)
}
 0x150   :  { %564 = dma.vmem_to_hbm [thread:$0]  %s559_s2, 2048, %s948_s4, [#allocation4], %s733_s25, %s733_s25, %s734_s26  }
 0x151   :  { %730 = dma.done.wait [#allocation4], 2048  }
 0x152   :  { %731 = vsyncadd [#allocation4], 4294965248 }
 0x153   :  { %568 = vsyncpa [#allocation3], 1 }
 0x154   :  { %569 = vsyncpa [#allocation6], 1 }
 0x155   :  { %570 = vsyncpa [#allocation4], 1 }

</bundles_post_ra>
